<compile_context>
chip_gen: v7x
topology: tpu7x:2x2x1
jax: 0.10.0
libtpu: 0.0.40
codegen_flags: <defaults>
</compile_context>

<pallas_src>
import jax
import jax.numpy as jnp
from jax.experimental import pallas as pl
from jax.experimental.pallas import tpu as pltpu

D_IN = 768
SENTIMENTS = 4
CATEGORIES = 7
N_PAD = 128             # lane-dense padded output width (>= SENTIMENTS)
MIN_PALLAS_BATCH = 128  # below this, plain XLA beats kernel launch overhead


def _round_up(x, m):
    return (x + m - 1) // m * m


def _choose_tb(B):
    """Batch tile: big enough to amortize ~0.35us/grid-step, >= ~4 steps so the
    'parallel' batch axis shards over v7x's 2 TensorCores, multiple of 16 for
    the bf16 sublane pack, capped at 2048 so double-buffered VMEM (~7.5 MiB)
    fits the 16 MiB default scoped limit on v5e."""
    if B <= 256:
        return _round_up(B, 16)
    return max(256, min(2048, _round_up(pl.cdiv(B, 4), 256)))


def classifier_kernel(x_ref, m_ref, w_ref, b_ref, o_ref):
    """tanh + CLS-mask + Linear(768 -> 128-padded) + ReLU on one batch tile.

    x: (TB, 768) bf16 (tok+type CLS embedding), m: (TB, 1) bf16 mask,
    w: (768, 128) bf16, b: (1, 128) f32, o: (TB, 128) bf16.
    """
    x = jnp.tanh(x_ref[...].astype(jnp.float32)) * m_ref[...].astype(jnp.float32)
    y = jnp.dot(x.astype(jnp.bfloat16), w_ref[...],
                preferred_element_type=jnp.float32)
    o_ref[...] = jnp.maximum(y + b_ref[...], 0.0).astype(o_ref.dtype)


def classifier_head(h_cls, mask_cls, w_pad, b_pad, *,
                    min_pallas_batch=MIN_PALLAS_BATCH):
    """h_cls: (B, 768) bf16, mask_cls: (B, 1) -> logits (B, 4) f32."""
    B = h_cls.shape[0]

    if B < min_pallas_batch:
        # Tiny-batch bypass: microseconds of fixed kernel cost for nanoseconds
        # of work; XLA's fused matmul wins outright here.
        x = jnp.tanh(h_cls.astype(jnp.float32)) * mask_cls.astype(jnp.float32)
        y = x @ w_pad[:, :SENTIMENTS].astype(jnp.float32) + b_pad[:, :SENTIMENTS]
        return jnp.maximum(y, 0.0)

    TB = _choose_tb(B)
    grid = (pl.cdiv(B, TB),)  # no explicit pad; Pallas masks the partial tail

    out = pl.pallas_call(
        classifier_kernel,
        out_shape=jax.ShapeDtypeStruct((B, N_PAD), jnp.bfloat16),
        grid_spec=pl.GridSpec(
            grid=grid,
            in_specs=[
                pl.BlockSpec((TB, D_IN), lambda i: (i, 0)),     # streamed x
                pl.BlockSpec((TB, 1), lambda i: (i, 0)),        # CLS attn mask
                pl.BlockSpec((D_IN, N_PAD), lambda i: (0, 0)),  # resident W
                pl.BlockSpec((1, N_PAD), lambda i: (0, 0)),     # resident b
            ],
            out_specs=pl.BlockSpec((TB, N_PAD), lambda i: (i, 0)),
        ),
        compiler_params=pltpu.CompilerParams(
            dimension_semantics=("parallel",)),
    )(h_cls, mask_cls, w_pad, b_pad)

    return out[:, :SENTIMENTS].astype(jnp.float32)


def prepare_params(params):
    """One-time param prep: bf16 embedding tables, lane-dense padded head."""
    return {
        "tok_emb": params["tok_emb"].astype(jnp.bfloat16),
        "type_emb": params["type_emb"].astype(jnp.bfloat16),
        "w_pad": jnp.pad(params["w"].astype(jnp.bfloat16),
                         ((0, 0), (0, N_PAD - SENTIMENTS))),
        "b_pad": jnp.pad(params["b"].astype(jnp.float32),
                         ((0, 0), (0, N_PAD - SENTIMENTS))),
    }


def addone_sparse_forward(input_ids, attention_mask, token_type_ids, prep,
                          *, min_pallas_batch=MIN_PALLAS_BATCH):
    # Encoder stand-in: only the CLS token (position 0) feeds the classifier,
    # so just its embedding row is built — one bf16 (B, 768) array, which is
    # the kernel input directly (tanh/mask happen inside the kernel).
    h_cls = (prep["tok_emb"][input_ids[:, 0]]
             + prep["type_emb"][token_type_ids[:, 0]])              # (B,768) bf16
    mask_cls = attention_mask[:, 0][:, None].astype(jnp.bfloat16)   # (B,1)

    logits = classifier_head(h_cls, mask_cls, prep["w_pad"], prep["b_pad"],
                             min_pallas_batch=min_pallas_batch)     # (B,4) f32

    # The 7 classifier "heads" are the SAME module ([head] * categories):
    # torch.stack(..., dim=-1) over identical outputs == broadcast, no copies.
    return jnp.broadcast_to(logits[..., None],
                            logits.shape + (CATEGORIES,))           # (B,4,7)


if __name__ == "__main__":
    B, S = 2, 8
    VOCAB = 128

    key = jax.random.PRNGKey(0)
    k_tok, k_type, k_w, k_b, k_ids = jax.random.split(key, 5)

    params = {
        "tok_emb": jax.random.normal(k_tok, (VOCAB, D_IN), jnp.float32) * 0.02,
        "type_emb": jax.random.normal(k_type, (2, D_IN), jnp.float32) * 0.02,
        # Deterministic Linear(768, 4) params (synthetic, not a checkpoint).
        "w": jax.random.normal(k_w, (D_IN, SENTIMENTS), jnp.float32) * 0.05,
        "b": jax.random.normal(k_b, (1, SENTIMENTS), jnp.float32) * 0.05,
    }
    prep = prepare_params(params)

    input_ids = jax.random.randint(k_ids, (B, S), 0, VOCAB, dtype=jnp.int32)
    attention_mask = jnp.ones((B, S), dtype=jnp.int32)
    token_type_ids = jnp.zeros((B, S), dtype=jnp.int32)

    # Plain-JAX f32 reference on the same bf16 embedding tables.
    h = (prep["tok_emb"][input_ids[:, 0]].astype(jnp.float32)
         + prep["type_emb"][token_type_ids[:, 0]].astype(jnp.float32))
    cls = jnp.tanh(h) * attention_mask[:, 0][:, None].astype(jnp.float32)
    ref = jnp.maximum(cls @ params["w"] + params["b"], 0.0)
    ref = jnp.broadcast_to(ref[..., None], ref.shape + (CATEGORIES,))

    # Default path: B=2 takes the tiny-batch XLA bypass.
    out_bypass = jax.block_until_ready(
        addone_sparse_forward(input_ids, attention_mask, token_type_ids, prep))
    # Forced Pallas path: exercises the TPU kernel itself.
    out_pallas = jax.block_until_ready(
        addone_sparse_forward(input_ids, attention_mask, token_type_ids, prep,
                              min_pallas_batch=0))

    assert out_bypass.shape == (B, SENTIMENTS, CATEGORIES), out_bypass.shape
    assert out_pallas.shape == (B, SENTIMENTS, CATEGORIES), out_pallas.shape
    # Tolerances loosened because the hot path runs bf16 embeddings / MXU / out.
    assert jnp.allclose(out_bypass, ref, atol=1e-2, rtol=1e-2), (
        float(jnp.max(jnp.abs(out_bypass - ref))))
    assert jnp.allclose(out_pallas, ref, atol=1e-2, rtol=1e-2), (
        float(jnp.max(jnp.abs(out_pallas - ref))))
    print("KERNEL_OK")
</pallas_src>

<mosaic_0001>
module attributes {stable_mosaic.version = 11 : i64} {
  func.func @classifier_kernel(%arg0: i32, %arg1: memref<16x768xbf16, #tpu.memory_space<vmem>>, %arg2: memref<16x1xbf16, #tpu.memory_space<vmem>>, %arg3: memref<768x128xbf16, #tpu.memory_space<vmem>>, %arg4: memref<1x128xf32, #tpu.memory_space<vmem>>, %arg5: memref<16x128xbf16, #tpu.memory_space<vmem>>) attributes {dimension_semantics = [#tpu.dimension_semantics<parallel>], iteration_bounds = array<i64: 1>, scalar_prefetch = 0 : i64, scratch_operands = 0 : i64, tpu.core_type = #tpu.core_type<tc>, window_params = [{transform_indices = @transform_0, window_bounds = array<i64: 16, 768>}, {transform_indices = @transform_1, window_bounds = array<i64: 16, 1>}, {pipeline_mode = #tpu.pipeline_mode<synchronous>, transform_indices = @transform_2, window_bounds = array<i64: 768, 128>}, {pipeline_mode = #tpu.pipeline_mode<synchronous>, transform_indices = @transform_3, window_bounds = array<i64: 1, 128>}, {transform_indices = @transform_4, window_bounds = array<i64: 16, 128>}]} {
    %c0 = arith.constant 0 : index
    %c0_0 = arith.constant 0 : index
    %0 = vector.load %arg1[%c0, %c0_0] : memref<16x768xbf16, #tpu.memory_space<vmem>>, vector<16x768xbf16>
    %1 = arith.extf %0 : vector<16x768xbf16> to vector<16x768xf32>
    %2 = math.tanh %1 : vector<16x768xf32>
    %c0_1 = arith.constant 0 : index
    %c0_2 = arith.constant 0 : index
    %3 = vector.load %arg2[%c0_1, %c0_2] : memref<16x1xbf16, #tpu.memory_space<vmem>>, vector<16x1xbf16>
    %4 = arith.extf %3 : vector<16x1xbf16> to vector<16x1xf32>
    %5 = vector.broadcast %4 : vector<16x1xf32> to vector<16x768xf32>
    %6 = arith.mulf %2, %5 : vector<16x768xf32>
    %7 = arith.truncf %6 : vector<16x768xf32> to vector<16x768xbf16>
    %c0_3 = arith.constant 0 : index
    %c0_4 = arith.constant 0 : index
    %8 = vector.load %arg3[%c0_3, %c0_4] : memref<768x128xbf16, #tpu.memory_space<vmem>>, vector<768x128xbf16>
    %cst = arith.constant dense<0.000000e+00> : vector<16x128xf32>
    %9 = tpu.matmul %7, %8, %cst {dimension_numbers = #tpu.dot_dimension_numbers<[1], [0], [0], [1], [0, 0, 1, 1], [], []>} : vector<16x768xbf16>, vector<768x128xbf16>, vector<16x128xf32> -> vector<16x128xf32>
    %c0_5 = arith.constant 0 : index
    %c0_6 = arith.constant 0 : index
    %10 = vector.load %arg4[%c0_5, %c0_6] : memref<1x128xf32, #tpu.memory_space<vmem>>, vector<1x128xf32>
    %11 = vector.broadcast %10 : vector<1x128xf32> to vector<16x128xf32>
    %12 = arith.addf %9, %11 : vector<16x128xf32>
    %cst_7 = arith.constant 0.000000e+00 : f32
    %13 = vector.broadcast %cst_7 : f32 to vector<16x128xf32>
    %14 = arith.maximumf %12, %13 : vector<16x128xf32>
    %15 = arith.truncf %14 : vector<16x128xf32> to vector<16x128xbf16>
    %c0_8 = arith.constant 0 : index
    %c0_9 = arith.constant 0 : index
    %16 = vector.load %arg5[%c0_8, %c0_9] : memref<16x128xbf16, #tpu.memory_space<vmem>>, vector<16x128xbf16>
    tpu.vector_store %arg5[%c0_8, %c0_9], %15 {strides = array<i32>} : memref<16x128xbf16, #tpu.memory_space<vmem>>, vector<16x128xbf16>,
    return
  }
  func.func @transform_0(%arg0: i32) -> (i32, i32) {
    %c0_i32 = arith.constant 0 : i32
    %c0_i32_0 = arith.constant 0 : i32
    return %arg0, %c0_i32 : i32, i32
  }
  func.func @transform_1(%arg0: i32) -> (i32, i32) {
    %c0_i32 = arith.constant 0 : i32
    %c0_i32_0 = arith.constant 0 : i32
    return %arg0, %c0_i32 : i32, i32
  }
  func.func @transform_2(%arg0: i32) -> (i32, i32) {
    %c0_i32 = arith.constant 0 : i32
    %c0_i32_0 = arith.constant 0 : i32
    %c0_i32_1 = arith.constant 0 : i32
    return %c0_i32, %c0_i32_0 : i32, i32
  }
  func.func @transform_3(%arg0: i32) -> (i32, i32) {
    %c0_i32 = arith.constant 0 : i32
    %c0_i32_0 = arith.constant 0 : i32
    %c0_i32_1 = arith.constant 0 : i32
    return %c0_i32, %c0_i32_0 : i32, i32
  }
  func.func @transform_4(%arg0: i32) -> (i32, i32) {
    %c0_i32 = arith.constant 0 : i32
    %c0_i32_0 = arith.constant 0 : i32
    return %arg0, %c0_i32 : i32, i32
  }
}

</mosaic_0001>

<bundles_post_ra>
// kernel: tpu_custom_call.1
= control target key start
LH: loop header
LB: loop body
LE: loop exit
PB: predicated region body
PF: predicated region fallthrough
CT: control target
= control target key end

     0   :  { %9 = vsyncpa [#allocation3], 0  ;;  %s1371_s0 = inlined_call_operand.hbm [shape: bf16[2,768], index: 0, kind: input, shape index: {}]   ;;  %s1372_s1 = inlined_call_operand.vmem [shape: bf16[2,1], index: 1, kind: input, shape index: {}]   ;;  %s1373_s2 = inlined_call_operand.hbm [shape: bf16[768,128], index: 2, kind: input, shape index: {}]   ;;  %s1374_s3 = inlined_call_operand.vmem [shape: f32[1,128], index: 3, kind: input, shape index: {}]   ;;  %s1375_s4 = inlined_call_operand.hbm [shape: bf16[2,128], index: 4, kind: output, shape index: {}]  }
   0x1   :  { %10 = vsyncpa [#allocation6], 0 }
   0x2   :  { %11 = vsyncpa [#allocation4], 0 }
   0x3   :  { %16 = vsyncadd [#allocation3], 672  ;;  %s1265_s15 = smov [#allocation2]   ;;  %s1193_s19 = scalar_lea.hbm %s1371_s0, 96 }
   0x4   :  { %s17_s16 = sshll.u32 %s1265_s15, 4  ;;  %p1194_p0 = scmp.ne.s32.totalorder %s1371_s0, %s1193_s19  ;;  %s18_s16 = int_to_ptr.vmem [resolvable:$true] %s17_s16 }
   0x5   :  { %p1197_p1 = scmp.lt.u32.totalorder %s1193_s19, %s1371_s0 }
   0x7   :  { %p1199_p2 = pnand %p1197_p1, %p1194_p0 }
   0x9   :  { %1202 = shalt.err (!%p1199_p2)
}
   0xa   :  { %s1203_s24 = scalar_lea.vmem %s18_s16, 96  ;;  %s1207_s25 = scalar_lea.vmem %s18_s16, 768 }
   0xb   :  { %p1204_p3 = scmp.ne.s32.totalorder %s18_s16, %s1203_s24  ;;  %p1208_p4 = scmp.lt.s32.totalorder %s18_s16, %s18_s16 }
   0xc   :  { %p1209_p5 = scmp.lt.s32.totalorder %s1207_s25, %s1203_s24 }
   0xe   :  { %p1210_p6 = por %p1209_p5, %p1208_p4 }
  0x10   :  { %p1211_p7 = pnand %p1210_p6, %p1204_p3 }
  0x12   :  { %1214 = shalt.err (!%p1211_p7)
}
  0x13   :  { %s1266_s26 = smov 96   ;;  %s1267_s27 = smov 6  }
  0x14   :  { %23 = dma.hbm_to_vmem [thread:$0]  %s1371_s0, 96, %s18_s16, [#allocation3], %s1266_s26, %s1266_s26, %s1267_s27  }
  0x15   :  { %s1268_s30 = smov [#allocation5]   ;;  %s1215_s8 = scalar_lea.hbm %s1373_s2, 6144 }
  0x16   :  { %s31_s5 = sshll.u32 %s1268_s30, 4  ;;  %p1216_p8 = scmp.ne.s32.totalorder %s1373_s2, %s1215_s8  ;;  %s32_s5 = int_to_ptr.vmem [resolvable:$true] %s31_s5 }
  0x17   :  { %p1219_p9 = scmp.lt.u32.totalorder %s1215_s8, %s1373_s2 }
  0x19   :  { %p1221_p10 = pnand %p1219_p9, %p1216_p8 }
  0x1b   :  { %1224 = shalt.err (!%p1221_p10)
}
  0x1c   :  { %s1225_s13 = scalar_lea.vmem %s32_s5, 6144  ;;  %p1230_p12 = scmp.lt.s32.totalorder %s32_s5, %s32_s5 }
  0x1d   :  { %p1226_p11 = scmp.ne.s32.totalorder %s32_s5, %s1225_s13  ;;  %p1231_p13 = scmp.lt.s32.totalorder %s1225_s13, %s1225_s13 }
  0x1f   :  { %p1232_p0 = por %p1231_p13, %p1230_p12 }
  0x21   :  { %p1233_p1 = pnand %p1232_p0, %p1226_p11 }
  0x23   :  { %1236 = shalt.err (!%p1233_p1)
}
  0x24   :  { %s1269_s0 = smov 64   ;;  %s1270_s14 = smov 4  }
  0x25   :  { %37 = dma.hbm_to_vmem [thread:$0]  %s1373_s2, 6144, %s32_s5, [#allocation6], %s1269_s0, %s1269_s0, %s1270_s14  }
  0x26   :  { %1259 = dma.done.wait [#allocation3], 768  }
  0x27   :  { %1260 = vsyncadd [#allocation3], 4294966528 }
  0x28   :  { %1261 = dma.done.wait [#allocation6], 6144  }
  0x29   :  { %1262 = vsyncadd [#allocation6], 4294961152  ;;  %v1271_v0 = vmov 0   ;;  %v91_v1 = vld [vmem:[%s1372_s1 + $0x4] sm:$0x1]  ;;  %v1113_v18 = vld [vmem:[#allocation5 + $0x40] sm:$0xff]  }
  0x2a   :  { %1102 = vset.pattern.permute.xlu1 %v1271_v0  ;;  %1091 = vset.pattern.permute.xlu0 %v1271_v0  ;;  %v92_v2 = vld [vmem:[%s1372_s1 + $0x5] sm:$0x1]  ;;  %v87_v3 = vld [vmem:[%s1372_s1] sm:$0x1]  ;;  %v99_v4 = vunpack.c.l.bf16 %v91_v1  ;;  %v88_v6 = vld [vmem:[%s1372_s1 + $0x1] sm:$0x1] }
  0x2b   :  { %v100_v5 = vunpack.c.l.bf16 %v92_v2  ;;  %v95_v7 = vunpack.c.l.bf16 %v87_v3  ;;  %v93_v8 = vld [vmem:[%s1372_s1 + $0x6] sm:$0x1]  ;;  %v94_v9 = vld [vmem:[%s1372_s1 + $0x7] sm:$0x1]  ;;  %v96_v10 = vunpack.c.l.bf16 %v88_v6  ;;  %v89_v13 = vld [vmem:[%s1372_s1 + $0x2] sm:$0x1]  ;;  %1012 = vmatprep.subr.bf16.mxu0 %v1113_v18 }
  0x2c   :  { %v101_v11 = vunpack.c.l.bf16 %v93_v8  ;;  %v102_v12 = vunpack.c.l.bf16 %v94_v9  ;;  %v90_v14 = vld [vmem:[%s1372_s1 + $0x3] sm:$0x1]  ;;  %v97_v16 = vunpack.c.l.bf16 %v89_v13  ;;  %v1114_v20 = vld [vmem:[#allocation5] sm:$0xff]   ;;  %v1117_v25 = vld [vmem:[#allocation5 + $0x48] sm:$0xff]   ;;  %v1272_v8 = vmov 269488144  }
  0x2d   :  { %v1103_v15 = vpack.i.bf16 %v100_v5, %v99_v4  ;;  %v98_v17 = vunpack.c.l.bf16 %v90_v14  ;;  %v1092_v19 = vpack.i.bf16 %v96_v10, %v95_v7  ;;  %v1115_v22 = vld [vmem:[#allocation5 + $0xc0] sm:$0xff]   ;;  %1013 = vmatpush3.bf16.msra.mxu0 %v1114_v20  ;;  %v1118_v26 = vld [vmem:[#allocation5 + $0x8] sm:$0xff]   ;;  %v1121_v29 = vld [vmem:[#allocation5 + $0x50] sm:$0xff]   ;;  %v109_v9 = vunpack.c.l.s4 %v1272_v8 }
  0x2e   :  { %v1108_v21 = vpack.i.bf16 %v102_v12, %v101_v11  ;;  %v1116_v24 = vld [vmem:[#allocation5 + $0x80] sm:$0xff]   ;;  %1034 = vmatprep.subr.bf16.mxu1 %v1115_v22  ;;  %1014 = vmatprep.subr.bf16.mxu0 %v1117_v25  ;;  %v1119_v27 = vld [vmem:[#allocation5 + $0xc8] sm:$0xff]   ;;  %v1122_v30 = vld [vmem:[#allocation5 + $0x10] sm:$0xff]   ;;  %v111_v10 = vlaneseq  ;;  %v1273_v22 = vmov 1983009808  }
  0x2f   :  { %1104 = vperm.xlu1 %1102, %v1103_v15   ;;  %1093 = vperm.xlu0 %1091, %v1092_v19   ;;  %v1097_v23 = vpack.i.bf16 %v98_v17, %v97_v16  ;;  %v1120_v28 = vld [vmem:[#allocation5 + $0x88] sm:$0xff]   ;;  %v1123_v31 = vld [vmem:[#allocation5 + $0xd0] sm:$0xff]   ;;  %v1125_v33 = vld [vmem:[#allocation5 + $0x58] sm:$0xff]   ;;  %v110_v18 = vunpack.c.0.s8 %v109_v9 }
  0x30   :  { %1035 = vmatpush3.bf16.msra.mxu1 %v1116_v24  ;;  %v1124_v32 = vld [vmem:[#allocation5 + $0x90] sm:$0xff]   ;;  %v1126_v34 = vld [vmem:[#allocation5 + $0x18] sm:$0xff]   ;;  %v1129_v37 = vld [vmem:[#allocation5 + $0x60] sm:$0xff]   ;;  %v1351_v19 = vshrl.u32 %v111_v10, 7 }
  0x31   :  { %1015 = vmatpush3.bf16.msra.mxu0 %v1118_v26  ;;  %1036 = vmatprep.subr.bf16.mxu1 %v1119_v27  ;;  %v1127_v35 = vld [vmem:[#allocation5 + $0xd8] sm:$0xff]   ;;  %v1130_v38 = vld [vmem:[#allocation5 + $0x20] sm:$0xff]   ;;  %v1133_v41 = vld [vmem:[#allocation5 + $0x68] sm:$0xff]  }
  0x32   :  { %1016 = vmatprep.subr.bf16.mxu0 %v1121_v29  ;;  %v1128_v36 = vld [vmem:[#allocation5 + $0x98] sm:$0xff]   ;;  %v1131_v39 = vld [vmem:[#allocation5 + $0xe0] sm:$0xff]   ;;  %v1134_v42 = vld [vmem:[#allocation5 + $0x28] sm:$0xff]   ;;  %v113_v27 = vsub.s32 %v110_v18, %v1351_v19 }
  0x33   :  { %1109 = vperm.xlu1 %1102, %v1108_v21   ;;  %1098 = vperm.xlu0 %1091, %v1097_v23   ;;  %v1132_v40 = vld [vmem:[#allocation5 + $0xa0] sm:$0xff]   ;;  %v1135_v43 = vld [vmem:[#allocation5 + $0xe8] sm:$0xff]   ;;  %v1137_v45 = vld [vmem:[#allocation5 + $0x70] sm:$0xff]   ;;  %v236_v23 = vunpack.c.l.s4 %v1273_v22 }
  0x34   :  { %1037 = vmatpush3.bf16.msra.mxu1 %v1120_v28  ;;  %v1136_v44 = vld [vmem:[#allocation5 + $0xa8] sm:$0xff]   ;;  %v1138_v46 = vld [vmem:[#allocation5 + $0x30] sm:$0xff]   ;;  %v1141_v49 = vld [vmem:[#allocation5 + $0x78] sm:$0xff]  }
  0x35   :  { %1017 = vmatpush3.bf16.msra.mxu0 %v1122_v30  ;;  %1038 = vmatprep.subr.bf16.mxu1 %v1123_v31  ;;  %v1139_v47 = vld [vmem:[#allocation5 + $0xf0] sm:$0xff]   ;;  %v1142_v50 = vld [vmem:[#allocation5 + $0x38] sm:$0xff]   ;;  %v1145_v53 = vld [vmem:[#allocation5 + $0x140] sm:$0xff]   ;;  %v237_v29 = vunpack.c.0.s8 %v236_v23 }
  0x36   :  { %1018 = vmatprep.subr.bf16.mxu0 %v1125_v33  ;;  %v1140_v48 = vld [vmem:[#allocation5 + $0xb0] sm:$0xff]   ;;  %v1143_v51 = vld [vmem:[#allocation5 + $0xf8] sm:$0xff]   ;;  %v51_v54 = vld [vmem:[#allocation2 + $0x18] sm:$0x3f] }
  0x37   :  { %v1144_v52 = vld [vmem:[#allocation5 + $0xb8] sm:$0xff]   ;;  %v52_v55 = vld [vmem:[#allocation2 + $0x1e] sm:$0x3f]  ;;  %v63_v56 = vunpack.c.l.bf16 %v51_v54  ;;  %v64_v57 = vunpack.c.h.bf16 %v51_v54  ;;  %v50_v12 = vld [vmem:[#allocation2 + $0x12] sm:$0x3f] }
  0x38   :  { %1039 = vmatpush3.bf16.msra.mxu1 %v1124_v32  ;;  %v47_v58 = vld [vmem:[#allocation2] sm:$0x3f]  ;;  %v65_v59 = vunpack.c.l.bf16 %v52_v55  ;;  %v66_v60 = vunpack.c.h.bf16 %v52_v55  ;;  %v48_v61 = vld [vmem:[#allocation2 + $0x6] sm:$0x3f]  ;;  %v49_v6 = vld [vmem:[#allocation2 + $0xc] sm:$0x3f]  ;;  %v61_v16 = vunpack.c.l.bf16 %v50_v12  ;;  %v62_v20 = vunpack.c.h.bf16 %v50_v12 }
  0x39   :  { %1019 = vmatpush3.bf16.msra.mxu0 %v1126_v34  ;;  %1040 = vmatprep.subr.bf16.mxu1 %v1127_v35  ;;  %1161 = vtanh.f32 %v63_v56  ;;  %v55_v62 = vunpack.c.l.bf16 %v47_v58  ;;  %v56_v63 = vunpack.c.h.bf16 %v47_v58  ;;  %v53_v0 = vld [vmem:[#allocation2 + $0x24] sm:$0x3f]  ;;  %v57_v1 = vunpack.c.l.bf16 %v48_v61  ;;  %v54_v3 = vld [vmem:[#allocation2 + $0x2a] sm:$0x3f] }
  0x3a   :  { %1020 = vmatprep.subr.bf16.mxu0 %v1129_v37  ;;  %1163 = vtanh.f32 %v64_v57  ;;  %v58_v2 = vunpack.c.h.bf16 %v48_v61  ;;  %v67_v4 = vunpack.c.l.bf16 %v53_v0  ;;  %v68_v5 = vunpack.c.h.bf16 %v53_v0 }
  0x3b   :  { %1165 = vtanh.f32 %v65_v59  ;;  %v69_v7 = vunpack.c.l.bf16 %v54_v3  ;;  %v70_v11 = vunpack.c.h.bf16 %v54_v3  ;;  %v59_v13 = vunpack.c.l.bf16 %v49_v6 }
  0x3c   :  { %1041 = vmatpush3.bf16.msra.mxu1 %v1128_v36  ;;  %1167 = vtanh.f32 %v66_v60  ;;  %v60_v14 = vunpack.c.h.bf16 %v49_v6 }
  0x3d   :  { %1021 = vmatpush3.bf16.msra.mxu0 %v1130_v38  ;;  %1042 = vmatprep.subr.bf16.mxu1 %v1131_v39  ;;  %1169 = vtanh.f32 %v55_v62 }
  0x3e   :  { %1022 = vmatprep.subr.bf16.mxu0 %v1133_v41  ;;  %1171 = vtanh.f32 %v56_v63 }
  0x3f   :  { %1173 = vtanh.f32 %v57_v1 }
  0x40   :  { %1043 = vmatpush3.bf16.msra.mxu1 %v1132_v40  ;;  %1175 = vtanh.f32 %v58_v2 }
  0x41   :  { %1023 = vmatpush3.bf16.msra.mxu0 %v1134_v42  ;;  %1044 = vmatprep.subr.bf16.mxu1 %v1135_v43  ;;  %1177 = vtanh.f32 %v67_v4  ;;  %v240_v42 = vsub.s32 %v237_v29, %v1351_v19 }
  0x42   :  { %1024 = vmatprep.subr.bf16.mxu0 %v1137_v45  ;;  %1179 = vtanh.f32 %v68_v5 }
  0x43   :  { %v1162_v15 = vpop.eup %1161  ;;  %1181 = vtanh.f32 %v69_v7 }
  0x44   :  { %1045 = vmatpush3.bf16.msra.mxu1 %v1136_v44  ;;  %v1164_v17 = vpop.eup %1163  ;;  %1183 = vtanh.f32 %v70_v11 }
  0x45   :  { %1025 = vmatpush3.bf16.msra.mxu0 %v1138_v46  ;;  %1046 = vmatprep.subr.bf16.mxu1 %v1139_v47  ;;  %v1166_v21 = vpop.eup %1165  ;;  %1185 = vtanh.f32 %v59_v13 }
  0x46   :  { %1026 = vmatprep.subr.bf16.mxu0 %v1141_v49  ;;  %v1168_v24 = vpop.eup %1167  ;;  %1187 = vtanh.f32 %v60_v14 }
  0x47   :  { %v1170_v25 = vpop.eup %1169  ;;  %1189 = vtanh.f32 %v61_v16 }
  0x48   :  { %1047 = vmatpush3.bf16.msra.mxu1 %v1140_v48  ;;  %v1172_v26 = vpop.eup %1171  ;;  %1191 = vtanh.f32 %v62_v20 }
  0x49   :  { %1027 = vmatpush3.bf16.msra.mxu0 %v1142_v50  ;;  %1048 = vmatprep.subr.bf16.mxu1 %v1143_v51  ;;  %v1174_v28 = vpop.eup %1173 }
  0x4a   :  { %1056 = vmatprep.subr.bf16.mxu0 %v1145_v53  ;;  %v1176_v31 = vpop.eup %1175 }
  0x4b   :  { %v1178_v35 = vpop.eup %1177 }
  0x4c   :  { %1049 = vmatpush3.bf16.msra.mxu1 %v1144_v52  ;;  %v1180_v38 = vpop.eup %1179 }
  0x4d   :  { %v1182_v41 = vpop.eup %1181 }
  0x4e   :  { %v1184_v46 = vpop.eup %1183 }
  0x4f   :  { %v1186_v52 = vpop.eup %1185 }
  0x50   :  { %v1188_v57 = vpop.eup %1187 }
  0x51   :  { %v1190_v62 = vpop.eup %1189 }
  0x52   :  { %v1192_v3 = vpop.eup %1191 }
  0xae   :  { %v1105_v30 = vpop.permute.xlu1 %1104  ;;  %v1094_v34 = vpop.permute.xlu0 %1093 }
  0xaf   :  { %v1107_v32 = vunpack.i.h.bf16 %v1105_v30  ;;  %v1106_v33 = vunpack.i.l.bf16 %v1105_v30  ;;  %v1096_v36 = vunpack.i.h.bf16 %v1094_v34  ;;  %v1095_v37 = vunpack.i.l.bf16 %v1094_v34 }
  0xb1   :  { %v174_v39 = vrot.slane %v1107_v32, %v113_v27  ;;  %v162_v40 = vrot.slane %v1106_v33, %v113_v27  ;;  %v126_v43 = vrot.slane %v1096_v36, %v113_v27  ;;  %v114_v44 = vrot.slane %v1095_v37, %v113_v27 }
  0xb2   :  { %v1110_v45 = vpop.permute.xlu1 %1109  ;;  %v1099_v51 = vpop.permute.xlu0 %1098 }
  0xb3   :  { %v207_v47 = vmul.f32 %v1162_v15, %v162_v40  ;;  %v208_v48 = vmul.f32 %v1164_v17, %v162_v40  ;;  %v209_v49 = vmul.f32 %v1166_v21, %v174_v39  ;;  %v210_v50 = vmul.f32 %v1168_v24, %v174_v39 }
  0xb4   :  { %v199_v53 = vmul.f32 %v1170_v25, %v114_v44  ;;  %v200_v54 = vmul.f32 %v1172_v26, %v114_v44  ;;  %v201_v55 = vmul.f32 %v1174_v28, %v126_v43  ;;  %v202_v56 = vmul.f32 %v1176_v31, %v126_v43 }
  0xb5   :  { %v321_v58 = vcombine.low %v208_v48, %v210_v50  ;;  %v1112_v59 = vunpack.i.h.bf16 %v1110_v45  ;;  %v1111_v60 = vunpack.i.l.bf16 %v1110_v45  ;;  %v1101_v61 = vunpack.i.h.bf16 %v1099_v51 }
  0xb6   :  { %v267_v63 = vcombine.low %v200_v54, %v202_v56  ;;  %v1100_v0 = vunpack.i.l.bf16 %v1099_v51  ;;  %v231_v1 = vcombine.low %v199_v53, %v201_v55  ;;  %v285_v2 = vcombine.low %v207_v47, %v209_v49  ;;  %v1150_v56 = vld [vmem:[#allocation5 + $0x110] sm:$0xff]  }
  0xb7   :  { %v198_v4 = vrot.slane %v1112_v59, %v113_v27  ;;  %v186_v5 = vrot.slane %v1111_v60, %v113_v27  ;;  %v150_v6 = vrot.slane %v1101_v61, %v113_v27  ;;  %v232_v7 = vcombine.high %v199_v53, %v201_v55  ;;  %v1147_v53 = vld [vmem:[#allocation5 + $0x148] sm:$0xff]   ;;  %v1149_v55 = vld [vmem:[#allocation5 + $0x150] sm:$0xff]   ;;  %v1153_v59 = vld [vmem:[#allocation5 + $0x160] sm:$0xff]  }
  0xb8   :  { %v138_v8 = vrot.slane %v1100_v0, %v113_v27  ;;  %v241_v9 = vrot.slane %v231_v1, %v240_v42  ;;  %v295_v10 = vrot.slane %v285_v2, %v240_v42  ;;  %v286_v11 = vcombine.high %v207_v47, %v209_v49  ;;  %v1154_v60 = vld [vmem:[#allocation5 + $0x120] sm:$0xff]   ;;  %v1155_v61 = vld [vmem:[#allocation5 + $0x168] sm:$0xff]   ;;  %v1158_v0 = vld [vmem:[#allocation5 + $0x130] sm:$0xff]  }
  0xb9   :  { %v211_v12 = vmul.f32 %v1178_v35, %v186_v5  ;;  %v212_v13 = vmul.f32 %v1180_v38, %v186_v5  ;;  %v213_v14 = vmul.f32 %v1182_v41, %v198_v4  ;;  %v214_v15 = vmul.f32 %v1184_v46, %v198_v4  ;;  %v1159_v1 = vld [vmem:[#allocation5 + $0x178] sm:$0xff]  }
  0xba   :  { %v203_v16 = vmul.f32 %v1186_v52, %v138_v8  ;;  %v204_v17 = vmul.f32 %v1188_v57, %v138_v8  ;;  %v205_v18 = vmul.f32 %v1190_v62, %v150_v6  ;;  %v206_v20 = vmul.f32 %v1192_v3, %v150_v6  ;;  %v1146_v52 = vld [vmem:[#allocation5 + $0x100] sm:$0xff]   ;;  %v1151_v57 = vld [vmem:[#allocation5 + $0x158] sm:$0xff]   ;;  %v1156_v62 = vld [vmem:[#allocation5 + $0x128] sm:$0xff]  }
  0xbb   :  { %v322_v21 = vcombine.low %v212_v13, %v214_v15  ;;  %v287_v22 = vcombine.low %v211_v12, %v213_v14  ;;  %v248_v23 = vrot.slane %v232_v7, %v240_v42  ;;  %v288_v24 = vcombine.high %v211_v12, %v213_v14  ;;  %v1160_v2 = vld [vmem:[#allocation5 + $0x138] sm:$0xff]   ;;  %v958_v8 = vld [vmem:[%s1374_s3] ss:$0 sm:$0xff] }
  0xbc   :  { %v268_v25 = vcombine.low %v204_v17, %v206_v20  ;;  %v233_v26 = vcombine.low %v203_v16, %v205_v18  ;;  %v234_v28 = vcombine.high %v203_v16, %v205_v18  ;;  %v302_v29 = vrot.slane %v286_v11, %v240_v42 }
  0xbd   :  { %v309_v27 = vrot.slane %v287_v22, %v240_v42  ;;  %v316_v30 = vrot.slane %v288_v24, %v240_v42  ;;  %v275_v31 = vrot.slane %v267_v63, %v240_v42  ;;  %v329_v32 = vrot.slane %v321_v58, %v240_v42  ;;  %v1152_v58 = vld [vmem:[#allocation5 + $0x118] sm:$0xff]   ;;  %v1157_v63 = vld [vmem:[#allocation5 + $0x170] sm:$0xff]  }
  0xbe   :  { %v255_v33 = vrot.slane %v233_v26, %v240_v42  ;;  %v262_v34 = vrot.slane %v234_v28, %v240_v42  ;;  %v282_v35 = vrot.slane %v268_v25, %v240_v42  ;;  %v336_v36 = vrot.slane %v322_v21, %v240_v42  ;;  %v1148_v42 = vld [vmem:[#allocation5 + $0x108] sm:$0xff]  }
  0xbf   :  { %v318_v37 = vcombine.high %v295_v10, %v309_v27  ;;  %v320_v38 = vcombine.high %v302_v29, %v316_v30  ;;  %v317_v39 = vcombine.low %v295_v10, %v309_v27  ;;  %v319_v40 = vcombine.low %v302_v29, %v316_v30 }
  0xc0   :  { %v264_v41 = vcombine.high %v241_v9, %v255_v33  ;;  %v266_v43 = vcombine.high %v248_v23, %v262_v34  ;;  %v263_v44 = vcombine.low %v241_v9, %v255_v33  ;;  %v265_v45 = vcombine.low %v248_v23, %v262_v34 }
  0xc1   :  { %v284_v46 = vcombine.high %v275_v31, %v282_v35  ;;  %v338_v47 = vcombine.high %v329_v32, %v336_v36  ;;  %v283_v3 = vcombine.low %v275_v31, %v282_v35  ;;  %v337_v4 = vcombine.low %v329_v32, %v336_v36 }
  0xc2   :  { %v352_v48 = vpack.c.bf16 %v318_v37, %v264_v41  ;;  %v354_v49 = vpack.c.bf16 %v320_v38, %v266_v43  ;;  %v351_v50 = vpack.c.bf16 %v317_v39, %v263_v44  ;;  %v353_v51 = vpack.c.bf16 %v319_v40, %v265_v45 }
  0xc3   :  { %v356_v54 = vpack.c.bf16 %v338_v47, %v284_v46  ;;  %v355_v5 = vpack.c.bf16 %v337_v4, %v283_v3  ;;  %v1274_v25 = vmov 1966171168  }
  0xc4   :  { %780 = vmatprep.mubr.bf16.mxu0 %v352_v48  ;;  %821 = vmatprep.mubr.bf16.mxu1 %v354_v49  ;;  %v877_v26 = vunpack.c.l.s4 %v1274_v25 }
  0xc5   :  { %781 = vmatmul.mubr.bf16.vlgmr.msra.gmra.mrb[0].mxu0 %v351_v50  ;;  %822 = vmatmul.mubr.bf16.vlgmr.msra.gmra.mrb[0].mxu1 %v353_v51 }
  0xc6   :  { %1057 = vmatpush3.bf16.msra.mxu0 %v1146_v52  ;;  %862 = vmatprep.mubr.bf16.mxu0 %v356_v54  ;;  %v878_v33 = vunpack.c.0.s8 %v877_v26 }
  0xc7   :  { %1058 = vmatprep.subr.bf16.mxu0 %v1147_v53 }
  0xc8   :  { %v881_v37 = vsub.s32 %v878_v33, %v1351_v19 }
  0xca   :  { %1059 = vmatpush3.bf16.msra.mxu0 %v1148_v42 }
  0xcb   :  { %1060 = vmatprep.subr.bf16.mxu0 %v1149_v55 }
  0xce   :  { %1061 = vmatpush3.bf16.msra.mxu0 %v1150_v56 }
  0xcf   :  { %1062 = vmatprep.subr.bf16.mxu0 %v1151_v57 }
  0xd2   :  { %1063 = vmatpush3.bf16.msra.mxu0 %v1152_v58 }
  0xd3   :  { %1064 = vmatprep.subr.bf16.mxu0 %v1153_v59 }
  0xd6   :  { %1065 = vmatpush3.bf16.msra.mxu0 %v1154_v60 }
  0xd7   :  { %1066 = vmatprep.subr.bf16.mxu0 %v1155_v61 }
  0xda   :  { %1067 = vmatpush3.bf16.msra.mxu0 %v1156_v62 }
  0xdb   :  { %1068 = vmatprep.subr.bf16.mxu0 %v1157_v63 }
  0xde   :  { %1069 = vmatpush3.bf16.msra.mxu0 %v1158_v0 }
  0xdf   :  { %1070 = vmatprep.subr.bf16.mxu0 %v1159_v1 }
  0xe2   :  { %1071 = vmatpush3.bf16.msra.mxu0 %v1160_v2 }
  0xe5   :  { %863 = vmatmul.mubr.bf16.vlgmr.msra.gmra.mrb[4].mxu0 %v355_v5 }
 0x198   :  { %v1028_v6 = vpop.f32.mrb[0].mxu0  ;;  %v1050_v7 = vpop.f32.mrb[0].mxu1 }
 0x199   :  { %v1029_v9 = vpop.f32.mrb[1].mxu0  ;;  %v1051_v10 = vpop.f32.mrb[1].mxu1 }
 0x19a   :  { %v1030_v11 = vadd.f32 %v1029_v9, %v1028_v6  ;;  %v1052_v12 = vadd.f32 %v1051_v10, %v1050_v7  ;;  %v1031_v13 = vpop.f32.mrb[2].mxu0  ;;  %v1053_v14 = vpop.f32.mrb[2].mxu1 }
 0x19b   :  { %v1032_v15 = vpop.f32.mrb[3].mxu0  ;;  %v1054_v16 = vpop.f32.mrb[3].mxu1 }
 0x19c   :  { %v783_v17 = vadd.f32 %v1030_v11, %v958_v8  ;;  %v1033_v18 = vadd.f32 %v1032_v15, %v1031_v13  ;;  %v1055_v20 = vadd.f32 %v1054_v16, %v1053_v14 }
 0x19e   :  { %v824_v21 = vadd.f32 %v1052_v12, %v783_v17  ;;  %v786_v22 = vadd.f32 %v1033_v18, %v958_v8 }
 0x1a0   :  { %v827_v23 = vadd.f32 %v1055_v20, %v786_v22 }
 0x1b8   :  { %v1072_v24 = vpop.f32.mrb[4].mxu0 }
 0x1b9   :  { %v1073_v28 = vpop.f32.mrb[5].mxu0 }
 0x1ba   :  { %v1074_v29 = vadd.f32 %v1073_v28, %v1072_v24  ;;  %v1075_v27 = vpop.f32.mrb[6].mxu0 }
 0x1bb   :  { %v1076_v30 = vpop.f32.mrb[7].mxu0 }
 0x1bc   :  { %v865_v31 = vadd.f32 %v1074_v29, %v824_v21  ;;  %v1077_v32 = vadd.f32 %v1076_v30, %v1075_v27 }
 0x1be   :  { %v868_v34 = vadd.f32 %v1077_v32, %v827_v23  ;;  %v871_v35 = vmax.f32 %v865_v31, 0.0 }
 0x1c0   :  { %v872_v36 = vmax.f32 %v868_v34, 0.0 }
 0x1c2   :  { %v873_v38 = vpack.c.bf16 %v872_v36, %v871_v35  ;;  %v1007_v39 = vpack.c.bf16 %v872_v36, %v872_v36 }
 0x1c4   :  { %v882_v40 = vrot.slane %v873_v38, %v881_v37  ;;  %v889_v41 = vrot.slane %v1007_v39, %v881_v37 }
 0x1c6   :  { %v890_v43 = vcombine.high %v882_v40, %v882_v40  ;;  %v891_v44 = vcombine.high %v889_v41, %v889_v41  ;;  %v898_v45 = vrot.slane %v882_v40, %v881_v37  ;;  %v905_v46 = vrot.slane %v889_v41, %v881_v37  ;;  %1008 = vst.sshfl [vmem:[#allocation7] sm:$0x1 pattern:$0x73625140] %v882_v40 }
 0x1c7   :  { %1010 = vst.sshfl [vmem:[#allocation7 + $0x4] sm:$0x1 pattern:$0x73625140] %v889_v41 }
 0x1c8   :  { %v912_v47 = vrot.slane %v890_v43, %v881_v37  ;;  %v919_v48 = vrot.slane %v891_v44, %v881_v37  ;;  %v920_v49 = vcombine.high %v898_v45, %v898_v45  ;;  %v921_v50 = vcombine.high %v905_v46, %v905_v46  ;;  %1009 = vst.sshfl [vmem:[#allocation7 + $0x1] sm:$0x1 pattern:$0x73625140] %v890_v43 }
 0x1c9   :  { %1011 = vst.sshfl [vmem:[#allocation7 + $0x5] sm:$0x1 pattern:$0x73625140] %v891_v44 }
 0x1ca   :  { %v922_v51 = vcombine.high %v912_v47, %v912_v47  ;;  %v923_v52 = vcombine.high %v919_v48, %v919_v48  ;;  %934 = vst [vmem:[#allocation7 + $0x2] sm:$0x1] %v920_v49  ;;  %938 = vst [vmem:[#allocation7 + $0x6] sm:$0x1] %v921_v50 }
 0x1cc   :  { %935 = vst [vmem:[#allocation7 + $0x3] sm:$0x1] %v922_v51  ;;  %939 = vst [vmem:[#allocation7 + $0x7] sm:$0x1] %v923_v52 }
 0x1cd   :  { %944 = vsyncadd [#allocation4], 112  ;;  %s1275_s3 = smov [#allocation7]  }
 0x1ce   :  { %s945_s7 = sshll.u32 %s1275_s3, 4  ;;  %s946_s7 = int_to_ptr.vmem [resolvable:$true] %s945_s7 }
 0x1cf   :  { %s1237_s8 = scalar_lea.vmem %s946_s7, 16  ;;  %s1241_s9 = scalar_lea.vmem %s946_s7, 128 }
 0x1d0   :  { %p1238_p2 = scmp.ne.s32.totalorder %s946_s7, %s1237_s8  ;;  %p1242_p3 = scmp.lt.s32.totalorder %s946_s7, %s946_s7 }
 0x1d1   :  { %p1243_p4 = scmp.lt.s32.totalorder %s1241_s9, %s1237_s8 }
 0x1d3   :  { %p1244_p5 = por %p1243_p4, %p1242_p3 }
 0x1d5   :  { %p1245_p6 = pnand %p1244_p5, %p1238_p2 }
 0x1d7   :  { %1248 = shalt.err (!%p1245_p6)
}
 0x1d8   :  { %s1249_s12 = scalar_lea.hbm %s1375_s4, 16 }
 0x1d9   :  { %p1250_p7 = scmp.ne.s32.totalorder %s1375_s4, %s1249_s12  ;;  %p1253_p8 = scmp.lt.u32.totalorder %s1249_s12, %s1375_s4 }
 0x1db   :  { %p1255_p9 = pnand %p1253_p8, %p1250_p7 }
 0x1dd   :  { %1258 = shalt.err (!%p1255_p9)
}
 0x1de   :  { %s1276_s16 = smov 16   ;;  %s1277_s17 = smov 1  }
 0x1df   :  { %951 = dma.vmem_to_hbm [thread:$0]  %s946_s7, 16, %s1375_s4, [#allocation4], %s1276_s16, %s1276_s16, %s1277_s17  }
 0x1e0   :  { %1263 = dma.done.wait [#allocation4], 128  }
 0x1e1   :  { %1264 = vsyncadd [#allocation4], 4294967168 }
 0x1e2   :  { %955 = vsyncpa [#allocation3], 1 }
 0x1e3   :  { %956 = vsyncpa [#allocation6], 1 }
 0x1e4   :  { %957 = vsyncpa [#allocation4], 1 }

</bundles_post_ra>
